<compile_context>
chip_gen: v5e
topology: v5e:2x2
jax: 0.10.0
libtpu: 0.0.40
codegen_flags: <defaults>
</compile_context>

<pallas_src>
import jax
import jax.numpy as jnp
from jax import lax
from jax.experimental import pallas as pl
from jax.experimental.pallas import tpu as pltpu


def _make_kernel(tile_n):
    def kernel(idx_ref, w_ref, img_ref, out_ref):
        # idx_ref : SMEM (4, tile_n) int32 -- flat HW indices of the 4 taps
        # w_ref   : SMEM (4, tile_n) f32   -- bilinear weights (precomputed)
        # img_ref : VMEM (H*W, C)    f32   -- resident flattened image
        # out_ref : VMEM (tile_n, C) f32

        def body(n, carry):
            # 4-tap gather: dynamic-sublane loads from the resident image.
            v00 = img_ref[pl.ds(idx_ref[0, n], 1), :]          # (1, C)
            v01 = img_ref[pl.ds(idx_ref[1, n], 1), :]
            v10 = img_ref[pl.ds(idx_ref[2, n], 1), :]
            v11 = img_ref[pl.ds(idx_ref[3, n], 1), :]
            # Blend with SMEM scalar weights (scalar->vector broadcast, VPU).
            out_ref[pl.ds(n, 1), :] = (w_ref[0, n] * v00 + w_ref[1, n] * v01
                                       + w_ref[2, n] * v10 + w_ref[3, n] * v11)
            return carry

        # Unrolled fori_loop: gives the scheduler visibility to hide the
        # sld -> address -> vld latency chain across iterations.
        lax.fori_loop(0, tile_n, body, 0, unroll=8)

    return kernel


def _pick_vmem_limit():
    """Generation-aware VMEM limit: ~96 MiB on v5e/v6e, capped 48 MiB on v7x."""
    try:
        cap = pltpu.get_tpu_info().vmem_capacity_bytes
    except Exception:
        cap = 64 * 1024 * 1024  # conservative default (v7x per-TC)
    if cap >= 100 * 1024 * 1024:
        return 96 * 1024 * 1024
    return 48 * 1024 * 1024


def bilinear_sample(xs, image_hwc, *, tile_n=512):
    """xs: (N, 2) float32 normalized (x, y); image_hwc: (H, W, C) float32."""
    H, W, C = image_hwc.shape
    N = xs.shape[0]
    HW = H * W

    # Query tile: large enough to amortize per-step overhead; multiple of 8,
    # and either a multiple of 128 or the full padded extent (single tile),
    # so every BlockSpec trivially satisfies layout constraints.
    if N <= tile_n:
        tile_n = max(8, ((N + 7) // 8) * 8)
    else:
        tile_n = ((tile_n + 127) // 128) * 128
    n_tiles = pl.cdiv(N, tile_n)
    n_pad = n_tiles * tile_n

    img_flat = image_hwc.reshape(HW, C).astype(jnp.float32)
    xs = xs.astype(jnp.float32)

    # --- wrapper-side (O(N) XLA) neighbor indices + bilinear weights --------
    # Identical semantics to the PyTorch code: trunc-toward-zero (.long()),
    # clamp, +1, clamp; weights from the UNclamped truncation.
    scaled = xs * jnp.array([W, H], dtype=jnp.float32)            # (N, 2)
    idx = scaled.astype(jnp.int32)                                # trunc == .long()
    lerp = scaled - idx.astype(jnp.float32)
    x0 = jnp.clip(idx[:, 0], 0, W - 1)
    y0 = jnp.clip(idx[:, 1], 0, H - 1)
    x1 = jnp.minimum(x0 + 1, W - 1)
    y1 = jnp.minimum(y0 + 1, H - 1)
    flat_idx = jnp.stack(
        [y0 * W + x0, y0 * W + x1, y1 * W + x0, y1 * W + x1], axis=0
    ).astype(jnp.int32)                                           # (4, N)
    wx = lerp[:, 0]
    wy = lerp[:, 1]
    weights = jnp.stack(
        [(1.0 - wx) * (1.0 - wy), wx * (1.0 - wy),
         (1.0 - wx) * wy,         wx * wy], axis=0
    ).astype(jnp.float32)                                         # (4, N)

    pad = n_pad - N
    flat_idx = jnp.pad(flat_idx, ((0, 0), (0, pad)))   # pad idx 0: in-range
    weights = jnp.pad(weights, ((0, 0), (0, pad)))     # pad weight 0: writes 0

    kernel = _make_kernel(tile_n)

    # Resident-image spec: constant block index, single buffer. (Tiny guard in
    # case an older BlockSpec signature lacks pipeline_mode.)
    try:
        img_spec = pl.BlockSpec((HW, C), lambda i: (0, 0),
                                pipeline_mode=pl.Buffered(1))
    except TypeError:
        img_spec = pl.BlockSpec((HW, C), lambda i: (0, 0))

    cost = pl.CostEstimate(
        flops=int(N) * 7 * int(C),
        transcendentals=0,
        bytes_accessed=4 * (HW * C + 8 * n_pad + n_pad * C),
    )

    out = pl.pallas_call(
        kernel,
        out_shape=jax.ShapeDtypeStruct((n_pad, C), jnp.float32),
        grid_spec=pltpu.PrefetchScalarGridSpec(
            num_scalar_prefetch=0,
            grid=(n_tiles,),
            in_specs=[
                # per-tile neighbor indices -> SMEM, pipelined with the grid
                pl.BlockSpec((4, tile_n), lambda i: (0, i),
                             memory_space=pltpu.MemorySpace.SMEM),
                # per-tile bilinear weights -> SMEM
                pl.BlockSpec((4, tile_n), lambda i: (0, i),
                             memory_space=pltpu.MemorySpace.SMEM),
                # full image, fetched once, stays resident in VMEM
                img_spec,
            ],
            out_specs=pl.BlockSpec((tile_n, C), lambda i: (i, 0)),
        ),
        compiler_params=pltpu.CompilerParams(
            dimension_semantics=("parallel",),   # megacore-splits query tiles
            vmem_limit_bytes=_pick_vmem_limit(),
        ),
        cost_estimate=cost,
    )(flat_idx, weights, img_flat)

    return out[:N]


def _reference(xs, image_hwc):
    """Pure-JAX replica of the PyTorch forward, for verification."""
    H, W, _ = image_hwc.shape
    scaled = xs * jnp.array([W, H], dtype=jnp.float32)
    idx = scaled.astype(jnp.int32)
    lerp = scaled - idx.astype(jnp.float32)
    x0 = jnp.clip(idx[:, 0], 0, W - 1)
    y0 = jnp.clip(idx[:, 1], 0, H - 1)
    x1 = jnp.minimum(x0 + 1, W - 1)
    y1 = jnp.minimum(y0 + 1, H - 1)
    lx = lerp[:, 0:1]
    ly = lerp[:, 1:2]
    return (image_hwc[y0, x0] * (1 - lx) * (1 - ly)
            + image_hwc[y0, x1] * lx * (1 - ly)
            + image_hwc[y1, x0] * (1 - lx) * ly
            + image_hwc[y1, x1] * lx * ly)


if __name__ == "__main__":
    # Deterministic synthetic "image" (read_image replacement) and queries.
    H, W, C = 16, 16, 4
    N = 8

    key = jax.random.PRNGKey(0)
    k_img, k_xs = jax.random.split(key)
    image = jax.random.uniform(k_img, (H, W, C), dtype=jnp.float32)
    xs = jax.random.uniform(k_xs, (N, 2), dtype=jnp.float32)  # normalized (x, y)

    out = bilinear_sample(xs, image)
    out = jax.block_until_ready(out)

    ref = _reference(xs, image)
    assert out.shape == (N, C)
    assert jnp.allclose(out, ref, atol=1e-5, rtol=1e-5), "mismatch vs reference"

    print("KERNEL_OK")
</pallas_src>

<mosaic_0001>
module attributes {stable_mosaic.version = 11 : i64} {
  func.func @kernel(%arg0: i32, %arg1: memref<4x8xi32, #tpu.memory_space<smem>>, %arg2: memref<4x8xf32, #tpu.memory_space<smem>>, %arg3: memref<256x4xf32, #tpu.memory_space<vmem>>, %arg4: memref<8x4xf32, #tpu.memory_space<vmem>>) attributes {dimension_semantics = [#tpu.dimension_semantics<parallel>], iteration_bounds = array<i64: 1>, scalar_prefetch = 0 : i64, scratch_operands = 0 : i64, tpu.core_type = #tpu.core_type<tc>, window_params = [{transform_indices = @transform_0, window_bounds = array<i64: 4, 8>}, {transform_indices = @transform_1, window_bounds = array<i64: 4, 8>}, {pipeline_mode = #tpu.pipeline_mode<synchronous>, transform_indices = @transform_2, window_bounds = array<i64: 256, 4>}, {transform_indices = @transform_3, window_bounds = array<i64: 8, 4>}]} {
    %c0_i32 = arith.constant 0 : i32
    %c0 = arith.constant 0 : index
    %0 = arith.index_cast %c0_i32 : i32 to index
    %1 = memref.load %arg1[%c0, %0] : memref<4x8xi32, #tpu.memory_space<smem>>
    %2 = arith.index_cast %1 : i32 to index
    %c0_0 = arith.constant 0 : index
    %3 = vector.load %arg3[%2, %c0_0] : memref<256x4xf32, #tpu.memory_space<vmem>>, vector<1x4xf32>
    %c1 = arith.constant 1 : index
    %4 = arith.index_cast %c0_i32 : i32 to index
    %5 = memref.load %arg1[%c1, %4] : memref<4x8xi32, #tpu.memory_space<smem>>
    %6 = arith.index_cast %5 : i32 to index
    %c0_1 = arith.constant 0 : index
    %7 = vector.load %arg3[%6, %c0_1] : memref<256x4xf32, #tpu.memory_space<vmem>>, vector<1x4xf32>
    %c2 = arith.constant 2 : index
    %8 = arith.index_cast %c0_i32 : i32 to index
    %9 = memref.load %arg1[%c2, %8] : memref<4x8xi32, #tpu.memory_space<smem>>
    %10 = arith.index_cast %9 : i32 to index
    %c0_2 = arith.constant 0 : index
    %11 = vector.load %arg3[%10, %c0_2] : memref<256x4xf32, #tpu.memory_space<vmem>>, vector<1x4xf32>
    %c3 = arith.constant 3 : index
    %12 = arith.index_cast %c0_i32 : i32 to index
    %13 = memref.load %arg1[%c3, %12] : memref<4x8xi32, #tpu.memory_space<smem>>
    %14 = arith.index_cast %13 : i32 to index
    %c0_3 = arith.constant 0 : index
    %15 = vector.load %arg3[%14, %c0_3] : memref<256x4xf32, #tpu.memory_space<vmem>>, vector<1x4xf32>
    %c0_4 = arith.constant 0 : index
    %16 = arith.index_cast %c0_i32 : i32 to index
    %17 = memref.load %arg2[%c0_4, %16] : memref<4x8xf32, #tpu.memory_space<smem>>
    %18 = vector.broadcast %17 : f32 to vector<1x4xf32>
    %19 = arith.mulf %18, %3 : vector<1x4xf32>
    %c1_5 = arith.constant 1 : index
    %20 = arith.index_cast %c0_i32 : i32 to index
    %21 = memref.load %arg2[%c1_5, %20] : memref<4x8xf32, #tpu.memory_space<smem>>
    %22 = vector.broadcast %21 : f32 to vector<1x4xf32>
    %23 = arith.mulf %22, %7 : vector<1x4xf32>
    %24 = arith.addf %19, %23 : vector<1x4xf32>
    %c2_6 = arith.constant 2 : index
    %25 = arith.index_cast %c0_i32 : i32 to index
    %26 = memref.load %arg2[%c2_6, %25] : memref<4x8xf32, #tpu.memory_space<smem>>
    %27 = vector.broadcast %26 : f32 to vector<1x4xf32>
    %28 = arith.mulf %27, %11 : vector<1x4xf32>
    %29 = arith.addf %24, %28 : vector<1x4xf32>
    %c3_7 = arith.constant 3 : index
    %30 = arith.index_cast %c0_i32 : i32 to index
    %31 = memref.load %arg2[%c3_7, %30] : memref<4x8xf32, #tpu.memory_space<smem>>
    %32 = vector.broadcast %31 : f32 to vector<1x4xf32>
    %33 = arith.mulf %32, %15 : vector<1x4xf32>
    %34 = arith.addf %29, %33 : vector<1x4xf32>
    %35 = arith.index_cast %c0_i32 : i32 to index
    %c0_8 = arith.constant 0 : index
    %36 = vector.load %arg4[%35, %c0_8] : memref<8x4xf32, #tpu.memory_space<vmem>>, vector<1x4xf32>
    tpu.vector_store %arg4[%35, %c0_8], %34 {strides = array<i32>} : memref<8x4xf32, #tpu.memory_space<vmem>>, vector<1x4xf32>,
    %c1_i32 = arith.constant 1 : i32
    %c0_9 = arith.constant 0 : index
    %37 = arith.index_cast %c1_i32 : i32 to index
    %38 = memref.load %arg1[%c0_9, %37] : memref<4x8xi32, #tpu.memory_space<smem>>
    %39 = arith.index_cast %38 : i32 to index
    %c0_10 = arith.constant 0 : index
    %40 = vector.load %arg3[%39, %c0_10] : memref<256x4xf32, #tpu.memory_space<vmem>>, vector<1x4xf32>
    %c1_11 = arith.constant 1 : index
    %41 = arith.index_cast %c1_i32 : i32 to index
    %42 = memref.load %arg1[%c1_11, %41] : memref<4x8xi32, #tpu.memory_space<smem>>
    %43 = arith.index_cast %42 : i32 to index
    %c0_12 = arith.constant 0 : index
    %44 = vector.load %arg3[%43, %c0_12] : memref<256x4xf32, #tpu.memory_space<vmem>>, vector<1x4xf32>
    %c2_13 = arith.constant 2 : index
    %45 = arith.index_cast %c1_i32 : i32 to index
    %46 = memref.load %arg1[%c2_13, %45] : memref<4x8xi32, #tpu.memory_space<smem>>
    %47 = arith.index_cast %46 : i32 to index
    %c0_14 = arith.constant 0 : index
    %48 = vector.load %arg3[%47, %c0_14] : memref<256x4xf32, #tpu.memory_space<vmem>>, vector<1x4xf32>
    %c3_15 = arith.constant 3 : index
    %49 = arith.index_cast %c1_i32 : i32 to index
    %50 = memref.load %arg1[%c3_15, %49] : memref<4x8xi32, #tpu.memory_space<smem>>
    %51 = arith.index_cast %50 : i32 to index
    %c0_16 = arith.constant 0 : index
    %52 = vector.load %arg3[%51, %c0_16] : memref<256x4xf32, #tpu.memory_space<vmem>>, vector<1x4xf32>
    %c0_17 = arith.constant 0 : index
    %53 = arith.index_cast %c1_i32 : i32 to index
    %54 = memref.load %arg2[%c0_17, %53] : memref<4x8xf32, #tpu.memory_space<smem>>
    %55 = vector.broadcast %54 : f32 to vector<1x4xf32>
    %56 = arith.mulf %55, %40 : vector<1x4xf32>
    %c1_18 = arith.constant 1 : index
    %57 = arith.index_cast %c1_i32 : i32 to index
    %58 = memref.load %arg2[%c1_18, %57] : memref<4x8xf32, #tpu.memory_space<smem>>
    %59 = vector.broadcast %58 : f32 to vector<1x4xf32>
    %60 = arith.mulf %59, %44 : vector<1x4xf32>
    %61 = arith.addf %56, %60 : vector<1x4xf32>
    %c2_19 = arith.constant 2 : index
    %62 = arith.index_cast %c1_i32 : i32 to index
    %63 = memref.load %arg2[%c2_19, %62] : memref<4x8xf32, #tpu.memory_space<smem>>
    %64 = vector.broadcast %63 : f32 to vector<1x4xf32>
    %65 = arith.mulf %64, %48 : vector<1x4xf32>
    %66 = arith.addf %61, %65 : vector<1x4xf32>
    %c3_20 = arith.constant 3 : index
    %67 = arith.index_cast %c1_i32 : i32 to index
    %68 = memref.load %arg2[%c3_20, %67] : memref<4x8xf32, #tpu.memory_space<smem>>
    %69 = vector.broadcast %68 : f32 to vector<1x4xf32>
    %70 = arith.mulf %69, %52 : vector<1x4xf32>
    %71 = arith.addf %66, %70 : vector<1x4xf32>
    %72 = arith.index_cast %c1_i32 : i32 to index
    %c0_21 = arith.constant 0 : index
    %73 = vector.load %arg4[%72, %c0_21] : memref<8x4xf32, #tpu.memory_space<vmem>>, vector<1x4xf32>
    tpu.vector_store %arg4[%72, %c0_21], %71 {strides = array<i32>} : memref<8x4xf32, #tpu.memory_space<vmem>>, vector<1x4xf32>,
    %c2_i32 = arith.constant 2 : i32
    %c0_22 = arith.constant 0 : index
    %74 = arith.index_cast %c2_i32 : i32 to index
    %75 = memref.load %arg1[%c0_22, %74] : memref<4x8xi32, #tpu.memory_space<smem>>
    %76 = arith.index_cast %75 : i32 to index
    %c0_23 = arith.constant 0 : index
    %77 = vector.load %arg3[%76, %c0_23] : memref<256x4xf32, #tpu.memory_space<vmem>>, vector<1x4xf32>
    %c1_24 = arith.constant 1 : index
    %78 = arith.index_cast %c2_i32 : i32 to index
    %79 = memref.load %arg1[%c1_24, %78] : memref<4x8xi32, #tpu.memory_space<smem>>
    %80 = arith.index_cast %79 : i32 to index
    %c0_25 = arith.constant 0 : index
    %81 = vector.load %arg3[%80, %c0_25] : memref<256x4xf32, #tpu.memory_space<vmem>>, vector<1x4xf32>
    %c2_26 = arith.constant 2 : index
    %82 = arith.index_cast %c2_i32 : i32 to index
    %83 = memref.load %arg1[%c2_26, %82] : memref<4x8xi32, #tpu.memory_space<smem>>
    %84 = arith.index_cast %83 : i32 to index
    %c0_27 = arith.constant 0 : index
    %85 = vector.load %arg3[%84, %c0_27] : memref<256x4xf32, #tpu.memory_space<vmem>>, vector<1x4xf32>
    %c3_28 = arith.constant 3 : index
    %86 = arith.index_cast %c2_i32 : i32 to index
    %87 = memref.load %arg1[%c3_28, %86] : memref<4x8xi32, #tpu.memory_space<smem>>
    %88 = arith.index_cast %87 : i32 to index
    %c0_29 = arith.constant 0 : index
    %89 = vector.load %arg3[%88, %c0_29] : memref<256x4xf32, #tpu.memory_space<vmem>>, vector<1x4xf32>
    %c0_30 = arith.constant 0 : index
    %90 = arith.index_cast %c2_i32 : i32 to index
    %91 = memref.load %arg2[%c0_30, %90] : memref<4x8xf32, #tpu.memory_space<smem>>
    %92 = vector.broadcast %91 : f32 to vector<1x4xf32>
    %93 = arith.mulf %92, %77 : vector<1x4xf32>
    %c1_31 = arith.constant 1 : index
    %94 = arith.index_cast %c2_i32 : i32 to index
    %95 = memref.load %arg2[%c1_31, %94] : memref<4x8xf32, #tpu.memory_space<smem>>
    %96 = vector.broadcast %95 : f32 to vector<1x4xf32>
    %97 = arith.mulf %96, %81 : vector<1x4xf32>
    %98 = arith.addf %93, %97 : vector<1x4xf32>
    %c2_32 = arith.constant 2 : index
    %99 = arith.index_cast %c2_i32 : i32 to index
    %100 = memref.load %arg2[%c2_32, %99] : memref<4x8xf32, #tpu.memory_space<smem>>
    %101 = vector.broadcast %100 : f32 to vector<1x4xf32>
    %102 = arith.mulf %101, %85 : vector<1x4xf32>
    %103 = arith.addf %98, %102 : vector<1x4xf32>
    %c3_33 = arith.constant 3 : index
    %104 = arith.index_cast %c2_i32 : i32 to index
    %105 = memref.load %arg2[%c3_33, %104] : memref<4x8xf32, #tpu.memory_space<smem>>
    %106 = vector.broadcast %105 : f32 to vector<1x4xf32>
    %107 = arith.mulf %106, %89 : vector<1x4xf32>
    %108 = arith.addf %103, %107 : vector<1x4xf32>
    %109 = arith.index_cast %c2_i32 : i32 to index
    %c0_34 = arith.constant 0 : index
    %110 = vector.load %arg4[%109, %c0_34] : memref<8x4xf32, #tpu.memory_space<vmem>>, vector<1x4xf32>
    tpu.vector_store %arg4[%109, %c0_34], %108 {strides = array<i32>} : memref<8x4xf32, #tpu.memory_space<vmem>>, vector<1x4xf32>,
    %c3_i32 = arith.constant 3 : i32
    %c0_35 = arith.constant 0 : index
    %111 = arith.index_cast %c3_i32 : i32 to index
    %112 = memref.load %arg1[%c0_35, %111] : memref<4x8xi32, #tpu.memory_space<smem>>
    %113 = arith.index_cast %112 : i32 to index
    %c0_36 = arith.constant 0 : index
    %114 = vector.load %arg3[%113, %c0_36] : memref<256x4xf32, #tpu.memory_space<vmem>>, vector<1x4xf32>
    %c1_37 = arith.constant 1 : index
    %115 = arith.index_cast %c3_i32 : i32 to index
    %116 = memref.load %arg1[%c1_37, %115] : memref<4x8xi32, #tpu.memory_space<smem>>
    %117 = arith.index_cast %116 : i32 to index
    %c0_38 = arith.constant 0 : index
    %118 = vector.load %arg3[%117, %c0_38] : memref<256x4xf32, #tpu.memory_space<vmem>>, vector<1x4xf32>
    %c2_39 = arith.constant 2 : index
    %119 = arith.index_cast %c3_i32 : i32 to index
    %120 = memref.load %arg1[%c2_39, %119] : memref<4x8xi32, #tpu.memory_space<smem>>
    %121 = arith.index_cast %120 : i32 to index
    %c0_40 = arith.constant 0 : index
    %122 = vector.load %arg3[%121, %c0_40] : memref<256x4xf32, #tpu.memory_space<vmem>>, vector<1x4xf32>
    %c3_41 = arith.constant 3 : index
    %123 = arith.index_cast %c3_i32 : i32 to index
    %124 = memref.load %arg1[%c3_41, %123] : memref<4x8xi32, #tpu.memory_space<smem>>
    %125 = arith.index_cast %124 : i32 to index
    %c0_42 = arith.constant 0 : index
    %126 = vector.load %arg3[%125, %c0_42] : memref<256x4xf32, #tpu.memory_space<vmem>>, vector<1x4xf32>
    %c0_43 = arith.constant 0 : index
    %127 = arith.index_cast %c3_i32 : i32 to index
    %128 = memref.load %arg2[%c0_43, %127] : memref<4x8xf32, #tpu.memory_space<smem>>
    %129 = vector.broadcast %128 : f32 to vector<1x4xf32>
    %130 = arith.mulf %129, %114 : vector<1x4xf32>
    %c1_44 = arith.constant 1 : index
    %131 = arith.index_cast %c3_i32 : i32 to index
    %132 = memref.load %arg2[%c1_44, %131] : memref<4x8xf32, #tpu.memory_space<smem>>
    %133 = vector.broadcast %132 : f32 to vector<1x4xf32>
    %134 = arith.mulf %133, %118 : vector<1x4xf32>
    %135 = arith.addf %130, %134 : vector<1x4xf32>
    %c2_45 = arith.constant 2 : index
    %136 = arith.index_cast %c3_i32 : i32 to index
    %137 = memref.load %arg2[%c2_45, %136] : memref<4x8xf32, #tpu.memory_space<smem>>
    %138 = vector.broadcast %137 : f32 to vector<1x4xf32>
    %139 = arith.mulf %138, %122 : vector<1x4xf32>
    %140 = arith.addf %135, %139 : vector<1x4xf32>
    %c3_46 = arith.constant 3 : index
    %141 = arith.index_cast %c3_i32 : i32 to index
    %142 = memref.load %arg2[%c3_46, %141] : memref<4x8xf32, #tpu.memory_space<smem>>
    %143 = vector.broadcast %142 : f32 to vector<1x4xf32>
    %144 = arith.mulf %143, %126 : vector<1x4xf32>
    %145 = arith.addf %140, %144 : vector<1x4xf32>
    %146 = arith.index_cast %c3_i32 : i32 to index
    %c0_47 = arith.constant 0 : index
    %147 = vector.load %arg4[%146, %c0_47] : memref<8x4xf32, #tpu.memory_space<vmem>>, vector<1x4xf32>
    tpu.vector_store %arg4[%146, %c0_47], %145 {strides = array<i32>} : memref<8x4xf32, #tpu.memory_space<vmem>>, vector<1x4xf32>,
    %c4_i32 = arith.constant 4 : i32
    %c0_48 = arith.constant 0 : index
    %148 = arith.index_cast %c4_i32 : i32 to index
    %149 = memref.load %arg1[%c0_48, %148] : memref<4x8xi32, #tpu.memory_space<smem>>
    %150 = arith.index_cast %149 : i32 to index
    %c0_49 = arith.constant 0 : index
    %151 = vector.load %arg3[%150, %c0_49] : memref<256x4xf32, #tpu.memory_space<vmem>>, vector<1x4xf32>
    %c1_50 = arith.constant 1 : index
    %152 = arith.index_cast %c4_i32 : i32 to index
    %153 = memref.load %arg1[%c1_50, %152] : memref<4x8xi32, #tpu.memory_space<smem>>
    %154 = arith.index_cast %153 : i32 to index
    %c0_51 = arith.constant 0 : index
    %155 = vector.load %arg3[%154, %c0_51] : memref<256x4xf32, #tpu.memory_space<vmem>>, vector<1x4xf32>
    %c2_52 = arith.constant 2 : index
    %156 = arith.index_cast %c4_i32 : i32 to index
    %157 = memref.load %arg1[%c2_52, %156] : memref<4x8xi32, #tpu.memory_space<smem>>
    %158 = arith.index_cast %157 : i32 to index
    %c0_53 = arith.constant 0 : index
    %159 = vector.load %arg3[%158, %c0_53] : memref<256x4xf32, #tpu.memory_space<vmem>>, vector<1x4xf32>
    %c3_54 = arith.constant 3 : index
    %160 = arith.index_cast %c4_i32 : i32 to index
    %161 = memref.load %arg1[%c3_54, %160] : memref<4x8xi32, #tpu.memory_space<smem>>
    %162 = arith.index_cast %161 : i32 to index
    %c0_55 = arith.constant 0 : index
    %163 = vector.load %arg3[%162, %c0_55] : memref<256x4xf32, #tpu.memory_space<vmem>>, vector<1x4xf32>
    %c0_56 = arith.constant 0 : index
    %164 = arith.index_cast %c4_i32 : i32 to index
    %165 = memref.load %arg2[%c0_56, %164] : memref<4x8xf32, #tpu.memory_space<smem>>
    %166 = vector.broadcast %165 : f32 to vector<1x4xf32>
    %167 = arith.mulf %166, %151 : vector<1x4xf32>
    %c1_57 = arith.constant 1 : index
    %168 = arith.index_cast %c4_i32 : i32 to index
    %169 = memref.load %arg2[%c1_57, %168] : memref<4x8xf32, #tpu.memory_space<smem>>
    %170 = vector.broadcast %169 : f32 to vector<1x4xf32>
    %171 = arith.mulf %170, %155 : vector<1x4xf32>
    %172 = arith.addf %167, %171 : vector<1x4xf32>
    %c2_58 = arith.constant 2 : index
    %173 = arith.index_cast %c4_i32 : i32 to index
    %174 = memref.load %arg2[%c2_58, %173] : memref<4x8xf32, #tpu.memory_space<smem>>
    %175 = vector.broadcast %174 : f32 to vector<1x4xf32>
    %176 = arith.mulf %175, %159 : vector<1x4xf32>
    %177 = arith.addf %172, %176 : vector<1x4xf32>
    %c3_59 = arith.constant 3 : index
    %178 = arith.index_cast %c4_i32 : i32 to index
    %179 = memref.load %arg2[%c3_59, %178] : memref<4x8xf32, #tpu.memory_space<smem>>
    %180 = vector.broadcast %179 : f32 to vector<1x4xf32>
    %181 = arith.mulf %180, %163 : vector<1x4xf32>
    %182 = arith.addf %177, %181 : vector<1x4xf32>
    %183 = arith.index_cast %c4_i32 : i32 to index
    %c0_60 = arith.constant 0 : index
    %184 = vector.load %arg4[%183, %c0_60] : memref<8x4xf32, #tpu.memory_space<vmem>>, vector<1x4xf32>
    tpu.vector_store %arg4[%183, %c0_60], %182 {strides = array<i32>} : memref<8x4xf32, #tpu.memory_space<vmem>>, vector<1x4xf32>,
    %c5_i32 = arith.constant 5 : i32
    %c0_61 = arith.constant 0 : index
    %185 = arith.index_cast %c5_i32 : i32 to index
    %186 = memref.load %arg1[%c0_61, %185] : memref<4x8xi32, #tpu.memory_space<smem>>
    %187 = arith.index_cast %186 : i32 to index
    %c0_62 = arith.constant 0 : index
    %188 = vector.load %arg3[%187, %c0_62] : memref<256x4xf32, #tpu.memory_space<vmem>>, vector<1x4xf32>
    %c1_63 = arith.constant 1 : index
    %189 = arith.index_cast %c5_i32 : i32 to index
    %190 = memref.load %arg1[%c1_63, %189] : memref<4x8xi32, #tpu.memory_space<smem>>
    %191 = arith.index_cast %190 : i32 to index
    %c0_64 = arith.constant 0 : index
    %192 = vector.load %arg3[%191, %c0_64] : memref<256x4xf32, #tpu.memory_space<vmem>>, vector<1x4xf32>
    %c2_65 = arith.constant 2 : index
    %193 = arith.index_cast %c5_i32 : i32 to index
    %194 = memref.load %arg1[%c2_65, %193] : memref<4x8xi32, #tpu.memory_space<smem>>
    %195 = arith.index_cast %194 : i32 to index
    %c0_66 = arith.constant 0 : index
    %196 = vector.load %arg3[%195, %c0_66] : memref<256x4xf32, #tpu.memory_space<vmem>>, vector<1x4xf32>
    %c3_67 = arith.constant 3 : index
    %197 = arith.index_cast %c5_i32 : i32 to index
    %198 = memref.load %arg1[%c3_67, %197] : memref<4x8xi32, #tpu.memory_space<smem>>
    %199 = arith.index_cast %198 : i32 to index
    %c0_68 = arith.constant 0 : index
    %200 = vector.load %arg3[%199, %c0_68] : memref<256x4xf32, #tpu.memory_space<vmem>>, vector<1x4xf32>
    %c0_69 = arith.constant 0 : index
    %201 = arith.index_cast %c5_i32 : i32 to index
    %202 = memref.load %arg2[%c0_69, %201] : memref<4x8xf32, #tpu.memory_space<smem>>
    %203 = vector.broadcast %202 : f32 to vector<1x4xf32>
    %204 = arith.mulf %203, %188 : vector<1x4xf32>
    %c1_70 = arith.constant 1 : index
    %205 = arith.index_cast %c5_i32 : i32 to index
    %206 = memref.load %arg2[%c1_70, %205] : memref<4x8xf32, #tpu.memory_space<smem>>
    %207 = vector.broadcast %206 : f32 to vector<1x4xf32>
    %208 = arith.mulf %207, %192 : vector<1x4xf32>
    %209 = arith.addf %204, %208 : vector<1x4xf32>
    %c2_71 = arith.constant 2 : index
    %210 = arith.index_cast %c5_i32 : i32 to index
    %211 = memref.load %arg2[%c2_71, %210] : memref<4x8xf32, #tpu.memory_space<smem>>
    %212 = vector.broadcast %211 : f32 to vector<1x4xf32>
    %213 = arith.mulf %212, %196 : vector<1x4xf32>
    %214 = arith.addf %209, %213 : vector<1x4xf32>
    %c3_72 = arith.constant 3 : index
    %215 = arith.index_cast %c5_i32 : i32 to index
    %216 = memref.load %arg2[%c3_72, %215] : memref<4x8xf32, #tpu.memory_space<smem>>
    %217 = vector.broadcast %216 : f32 to vector<1x4xf32>
    %218 = arith.mulf %217, %200 : vector<1x4xf32>
    %219 = arith.addf %214, %218 : vector<1x4xf32>
    %220 = arith.index_cast %c5_i32 : i32 to index
    %c0_73 = arith.constant 0 : index
    %221 = vector.load %arg4[%220, %c0_73] : memref<8x4xf32, #tpu.memory_space<vmem>>, vector<1x4xf32>
    tpu.vector_store %arg4[%220, %c0_73], %219 {strides = array<i32>} : memref<8x4xf32, #tpu.memory_space<vmem>>, vector<1x4xf32>,
    %c6_i32 = arith.constant 6 : i32
    %c0_74 = arith.constant 0 : index
    %222 = arith.index_cast %c6_i32 : i32 to index
    %223 = memref.load %arg1[%c0_74, %222] : memref<4x8xi32, #tpu.memory_space<smem>>
    %224 = arith.index_cast %223 : i32 to index
    %c0_75 = arith.constant 0 : index
    %225 = vector.load %arg3[%224, %c0_75] : memref<256x4xf32, #tpu.memory_space<vmem>>, vector<1x4xf32>
    %c1_76 = arith.constant 1 : index
    %226 = arith.index_cast %c6_i32 : i32 to index
    %227 = memref.load %arg1[%c1_76, %226] : memref<4x8xi32, #tpu.memory_space<smem>>
    %228 = arith.index_cast %227 : i32 to index
    %c0_77 = arith.constant 0 : index
    %229 = vector.load %arg3[%228, %c0_77] : memref<256x4xf32, #tpu.memory_space<vmem>>, vector<1x4xf32>
    %c2_78 = arith.constant 2 : index
    %230 = arith.index_cast %c6_i32 : i32 to index
    %231 = memref.load %arg1[%c2_78, %230] : memref<4x8xi32, #tpu.memory_space<smem>>
    %232 = arith.index_cast %231 : i32 to index
    %c0_79 = arith.constant 0 : index
    %233 = vector.load %arg3[%232, %c0_79] : memref<256x4xf32, #tpu.memory_space<vmem>>, vector<1x4xf32>
    %c3_80 = arith.constant 3 : index
    %234 = arith.index_cast %c6_i32 : i32 to index
    %235 = memref.load %arg1[%c3_80, %234] : memref<4x8xi32, #tpu.memory_space<smem>>
    %236 = arith.index_cast %235 : i32 to index
    %c0_81 = arith.constant 0 : index
    %237 = vector.load %arg3[%236, %c0_81] : memref<256x4xf32, #tpu.memory_space<vmem>>, vector<1x4xf32>
    %c0_82 = arith.constant 0 : index
    %238 = arith.index_cast %c6_i32 : i32 to index
    %239 = memref.load %arg2[%c0_82, %238] : memref<4x8xf32, #tpu.memory_space<smem>>
    %240 = vector.broadcast %239 : f32 to vector<1x4xf32>
    %241 = arith.mulf %240, %225 : vector<1x4xf32>
    %c1_83 = arith.constant 1 : index
    %242 = arith.index_cast %c6_i32 : i32 to index
    %243 = memref.load %arg2[%c1_83, %242] : memref<4x8xf32, #tpu.memory_space<smem>>
    %244 = vector.broadcast %243 : f32 to vector<1x4xf32>
    %245 = arith.mulf %244, %229 : vector<1x4xf32>
    %246 = arith.addf %241, %245 : vector<1x4xf32>
    %c2_84 = arith.constant 2 : index
    %247 = arith.index_cast %c6_i32 : i32 to index
    %248 = memref.load %arg2[%c2_84, %247] : memref<4x8xf32, #tpu.memory_space<smem>>
    %249 = vector.broadcast %248 : f32 to vector<1x4xf32>
    %250 = arith.mulf %249, %233 : vector<1x4xf32>
    %251 = arith.addf %246, %250 : vector<1x4xf32>
    %c3_85 = arith.constant 3 : index
    %252 = arith.index_cast %c6_i32 : i32 to index
    %253 = memref.load %arg2[%c3_85, %252] : memref<4x8xf32, #tpu.memory_space<smem>>
    %254 = vector.broadcast %253 : f32 to vector<1x4xf32>
    %255 = arith.mulf %254, %237 : vector<1x4xf32>
    %256 = arith.addf %251, %255 : vector<1x4xf32>
    %257 = arith.index_cast %c6_i32 : i32 to index
    %c0_86 = arith.constant 0 : index
    %258 = vector.load %arg4[%257, %c0_86] : memref<8x4xf32, #tpu.memory_space<vmem>>, vector<1x4xf32>
    tpu.vector_store %arg4[%257, %c0_86], %256 {strides = array<i32>} : memref<8x4xf32, #tpu.memory_space<vmem>>, vector<1x4xf32>,
    %c7_i32 = arith.constant 7 : i32
    %c0_87 = arith.constant 0 : index
    %259 = arith.index_cast %c7_i32 : i32 to index
    %260 = memref.load %arg1[%c0_87, %259] : memref<4x8xi32, #tpu.memory_space<smem>>
    %261 = arith.index_cast %260 : i32 to index
    %c0_88 = arith.constant 0 : index
    %262 = vector.load %arg3[%261, %c0_88] : memref<256x4xf32, #tpu.memory_space<vmem>>, vector<1x4xf32>
    %c1_89 = arith.constant 1 : index
    %263 = arith.index_cast %c7_i32 : i32 to index
    %264 = memref.load %arg1[%c1_89, %263] : memref<4x8xi32, #tpu.memory_space<smem>>
    %265 = arith.index_cast %264 : i32 to index
    %c0_90 = arith.constant 0 : index
    %266 = vector.load %arg3[%265, %c0_90] : memref<256x4xf32, #tpu.memory_space<vmem>>, vector<1x4xf32>
    %c2_91 = arith.constant 2 : index
    %267 = arith.index_cast %c7_i32 : i32 to index
    %268 = memref.load %arg1[%c2_91, %267] : memref<4x8xi32, #tpu.memory_space<smem>>
    %269 = arith.index_cast %268 : i32 to index
    %c0_92 = arith.constant 0 : index
    %270 = vector.load %arg3[%269, %c0_92] : memref<256x4xf32, #tpu.memory_space<vmem>>, vector<1x4xf32>
    %c3_93 = arith.constant 3 : index
    %271 = arith.index_cast %c7_i32 : i32 to index
    %272 = memref.load %arg1[%c3_93, %271] : memref<4x8xi32, #tpu.memory_space<smem>>
    %273 = arith.index_cast %272 : i32 to index
    %c0_94 = arith.constant 0 : index
    %274 = vector.load %arg3[%273, %c0_94] : memref<256x4xf32, #tpu.memory_space<vmem>>, vector<1x4xf32>
    %c0_95 = arith.constant 0 : index
    %275 = arith.index_cast %c7_i32 : i32 to index
    %276 = memref.load %arg2[%c0_95, %275] : memref<4x8xf32, #tpu.memory_space<smem>>
    %277 = vector.broadcast %276 : f32 to vector<1x4xf32>
    %278 = arith.mulf %277, %262 : vector<1x4xf32>
    %c1_96 = arith.constant 1 : index
    %279 = arith.index_cast %c7_i32 : i32 to index
    %280 = memref.load %arg2[%c1_96, %279] : memref<4x8xf32, #tpu.memory_space<smem>>
    %281 = vector.broadcast %280 : f32 to vector<1x4xf32>
    %282 = arith.mulf %281, %266 : vector<1x4xf32>
    %283 = arith.addf %278, %282 : vector<1x4xf32>
    %c2_97 = arith.constant 2 : index
    %284 = arith.index_cast %c7_i32 : i32 to index
    %285 = memref.load %arg2[%c2_97, %284] : memref<4x8xf32, #tpu.memory_space<smem>>
    %286 = vector.broadcast %285 : f32 to vector<1x4xf32>
    %287 = arith.mulf %286, %270 : vector<1x4xf32>
    %288 = arith.addf %283, %287 : vector<1x4xf32>
    %c3_98 = arith.constant 3 : index
    %289 = arith.index_cast %c7_i32 : i32 to index
    %290 = memref.load %arg2[%c3_98, %289] : memref<4x8xf32, #tpu.memory_space<smem>>
    %291 = vector.broadcast %290 : f32 to vector<1x4xf32>
    %292 = arith.mulf %291, %274 : vector<1x4xf32>
    %293 = arith.addf %288, %292 : vector<1x4xf32>
    %294 = arith.index_cast %c7_i32 : i32 to index
    %c0_99 = arith.constant 0 : index
    %295 = vector.load %arg4[%294, %c0_99] : memref<8x4xf32, #tpu.memory_space<vmem>>, vector<1x4xf32>
    tpu.vector_store %arg4[%294, %c0_99], %293 {strides = array<i32>} : memref<8x4xf32, #tpu.memory_space<vmem>>, vector<1x4xf32>,
    %c8_i32 = arith.constant 8 : i32
    return
  }
  func.func @transform_0(%arg0: i32) -> (i32, i32) {
    %c0_i32 = arith.constant 0 : i32
    %c0_i32_0 = arith.constant 0 : i32
    return %c0_i32, %arg0 : i32, i32
  }
  func.func @transform_1(%arg0: i32) -> (i32, i32) {
    %c0_i32 = arith.constant 0 : i32
    %c0_i32_0 = arith.constant 0 : i32
    return %c0_i32, %arg0 : i32, i32
  }
  func.func @transform_2(%arg0: i32) -> (i32, i32) {
    %c0_i32 = arith.constant 0 : i32
    %c0_i32_0 = arith.constant 0 : i32
    %c0_i32_1 = arith.constant 0 : i32
    return %c0_i32, %c0_i32_0 : i32, i32
  }
  func.func @transform_3(%arg0: i32) -> (i32, i32) {
    %c0_i32 = arith.constant 0 : i32
    %c0_i32_0 = arith.constant 0 : i32
    return %arg0, %c0_i32 : i32, i32
  }
}

</mosaic_0001>

<bundles_post_ra>
// kernel: tpu_custom_call.1
= control target key start
LH: loop header
LB: loop body
LE: loop exit
PB: predicated region body
PF: predicated region fallthrough
CT: control target
= control target key end

     0   :  { %8 = vsyncpa [#allocation3], 0  ;;  %s550_s0 = inlined_call_operand.vmem [shape: s32[4,8], index: 0, kind: input, shape index: {}]   ;;  %s551_s1 = inlined_call_operand.vmem [shape: f32[4,8], index: 1, kind: input, shape index: {}]   ;;  %s552_s2 = inlined_call_operand.vmem [shape: f32[256,4], index: 2, kind: input, shape index: {}]   ;;  %s553_s3 = inlined_call_operand.vmem [shape: f32[8,4], index: 3, kind: output, shape index: {}]  }
   0x1   :  { %s15_s14 = sshll.u32 %s550_s0, 4  ;;  %s16_s14 = int_to_ptr.vmem [resolvable:$true] %s15_s14 }
   0x2   :  { %9 = vsyncpa [#allocation5], 0  ;;  %s24_s17 = sshll.u32 %s551_s1, 4  ;;  %s394_s18 = smov [#allocation2]   ;;  %s25_s17 = int_to_ptr.vmem [resolvable:$true] %s24_s17 }
   0x3   :  { %18 = dma.vmem_to_smem %s16_s14, 64, %s394_s18, [#allocation3]  }
   0x4   :  { %s395_s19 = smov [#allocation4]  }
   0x5   :  { %27 = dma.vmem_to_smem %s25_s17, 64, %s395_s19, [#allocation5]  }
   0x6   :  { %390 = dma.done.wait [#allocation3], 64  }
   0x7   :  { %391 = vsyncadd [#allocation3], 4294967232 }
   0x8   :  { %392 = dma.done.wait [#allocation5], 64  }
   0x9   :  { %393 = vsyncadd [#allocation5], 4294967232 }
   0xa   :  { %38 = sfence }
   0xb   :  { %s39_s20 = sld [smem:[#allocation2]]  ;;  %vm66_vm0 = vcmask 24576  }
   0xc   :  { %s302_s21 = sld [smem:[#allocation2 + $0x80]] }
   0xd   :  { %s303_s22 = sld [smem:[#allocation2 + $0x100]] }
   0xe   :  { %s304_s0 = sld [smem:[#allocation2 + $0x180]] }
   0xf   :  { %s51_s23 = sld [smem:[#allocation4]] }
  0x10   :  { %s305_s24 = sld [smem:[#allocation4 + $0x80]] }
  0x11   :  { %s40_s1 = scalar_lea.vmem %s552_s2, %s39_s20  ;;  %s306_s27 = sld [smem:[#allocation4 + $0x100]] }
  0x12   :  { %s43_s30 = scalar_lea.vmem %s552_s2, %s302_s21  ;;  %s307_s4 = sld [smem:[#allocation4 + $0x180]]  ;;  %v41_v0 = vld [vmem:[%s40_s1] sm:$0x1] }
  0x13   :  { %s46_s7 = scalar_lea.vmem %s552_s2, %s303_s22  ;;  %s308_s8 = sld [smem:[#allocation2 + $0x1]]  ;;  %v44_v1 = vld [vmem:[%s43_s30] sm:$0x1] }
  0x14   :  { %s49_s11 = scalar_lea.vmem %s552_s2, %s304_s0  ;;  %s309_s12 = sld [smem:[#allocation2 + $0x81]]  ;;  %v47_v2 = vld [vmem:[%s46_s7] sm:$0x1] }
  0x15   :  { %v52_v3 = vstv %s51_s23  ;;  %s310_s13 = sld [smem:[#allocation2 + $0x101]]  ;;  %v50_v4 = vld [vmem:[%s49_s11] sm:$0x1] }
  0x16   :  { %v53_v5 = vmul.f32 %v52_v3, %v41_v0  ;;  %v55_v6 = vstv %s305_s24  ;;  %s311_s14 = sld [smem:[#allocation2 + $0x181]] }
  0x17   :  { %v56_v7 = vmul.f32 %v55_v6, %v44_v1  ;;  %v59_v8 = vstv %s306_s27  ;;  %s312_s15 = sld [smem:[#allocation4 + $0x1]] }
  0x18   :  { %v60_v9 = vmul.f32 %v59_v8, %v47_v2  ;;  %v63_v10 = vstv %s307_s4  ;;  %s313_s16 = sld [smem:[#allocation4 + $0x81]] }
  0x19   :  { %v57_v11 = vadd.f32 %v56_v7, %v53_v5  ;;  %v64_v12 = vmul.f32 %v63_v10, %v50_v4  ;;  %s69_s19 = scalar_lea.vmem %s552_s2, %s308_s8  ;;  %s314_s20 = sld [smem:[#allocation4 + $0x101]] }
  0x1a   :  { %s72_s0 = scalar_lea.vmem %s552_s2, %s309_s12  ;;  %s315_s23 = sld [smem:[#allocation4 + $0x181]]  ;;  %v70_v14 = vld [vmem:[%s69_s19] sm:$0x1] }
  0x1b   :  { %v61_v13 = vadd.f32 %v60_v9, %v57_v11  ;;  %s75_s26 = scalar_lea.vmem %s552_s2, %s310_s13  ;;  %s316_s1 = sld [smem:[#allocation2 + $0x2]]  ;;  %v73_v15 = vld [vmem:[%s72_s0] sm:$0x1] }
  0x1c   :  { %s78_s29 = scalar_lea.vmem %s552_s2, %s311_s14  ;;  %s317_s30 = sld [smem:[#allocation2 + $0x82]]  ;;  %v76_v17 = vld [vmem:[%s75_s26] sm:$0x1] }
  0x1d   :  { %v65_v16 = vadd.f32 %v64_v12, %v61_v13  ;;  %v81_v18 = vstv %s312_s15  ;;  %s318_s4 = sld [smem:[#allocation2 + $0x102]]  ;;  %v79_v19 = vld [vmem:[%s78_s29] sm:$0x1] }
  0x1e   :  { %v82_v20 = vmul.f32 %v81_v18, %v70_v14  ;;  %v84_v21 = vstv %s313_s16  ;;  %s319_s5 = sld [smem:[#allocation2 + $0x182]] }
  0x1f   :  { %67 = vst.msk [vmem:[%s553_s3] sm:$0x1] %vm66_vm0, %v65_v16  ;;  %v85_v22 = vmul.f32 %v84_v21, %v73_v15  ;;  %v88_v23 = vstv %s314_s20  ;;  %s320_s8 = sld [smem:[#allocation4 + $0x2]] }
  0x20   :  { %v89_v24 = vmul.f32 %v88_v23, %v76_v17  ;;  %v92_v25 = vstv %s315_s23  ;;  %s321_s9 = sld [smem:[#allocation4 + $0x82]] }
  0x21   :  { %v86_v26 = vadd.f32 %v85_v22, %v82_v20  ;;  %v93_v27 = vmul.f32 %v92_v25, %v79_v19  ;;  %s97_s12 = scalar_lea.vmem %s552_s2, %s316_s1  ;;  %s322_s13 = sld [smem:[#allocation4 + $0x102]] }
  0x22   :  { %s100_s16 = scalar_lea.vmem %s552_s2, %s317_s30  ;;  %s323_s17 = sld [smem:[#allocation4 + $0x182]]  ;;  %v98_v29 = vld [vmem:[%s97_s12] sm:$0x1] }
  0x23   :  { %v90_v28 = vadd.f32 %v89_v24, %v86_v26  ;;  %s103_s20 = scalar_lea.vmem %s552_s2, %s318_s4  ;;  %s324_s21 = sld [smem:[#allocation2 + $0x3]]  ;;  %v101_v30 = vld [vmem:[%s100_s16] sm:$0x1] }
  0x24   :  { %s106_s23 = scalar_lea.vmem %s552_s2, %s319_s5  ;;  %s325_s24 = sld [smem:[#allocation2 + $0x83]]  ;;  %v104_v32 = vld [vmem:[%s103_s20] sm:$0x1] }
  0x25   :  { %v94_v31 = vadd.f32 %v93_v27, %v90_v28  ;;  %v109_v33 = vstv %s320_s8  ;;  %s326_s25 = sld [smem:[#allocation2 + $0x103]]  ;;  %v107_v34 = vld [vmem:[%s106_s23] sm:$0x1] }
  0x26   :  { %v110_v35 = vmul.f32 %v109_v33, %v98_v29  ;;  %v112_v36 = vstv %s321_s9  ;;  %s327_s26 = sld [smem:[#allocation2 + $0x183]] }
  0x27   :  { %95 = vst.msk [vmem:[%s553_s3 + $0x1] sm:$0x1] %vm66_vm0, %v94_v31  ;;  %v113_v37 = vmul.f32 %v112_v36, %v101_v30  ;;  %v116_v38 = vstv %s322_s13  ;;  %s328_s28 = sld [smem:[#allocation4 + $0x3]] }
  0x28   :  { %v117_v39 = vmul.f32 %v116_v38, %v104_v32  ;;  %v120_v40 = vstv %s323_s17  ;;  %s329_s29 = sld [smem:[#allocation4 + $0x83]] }
  0x29   :  { %v114_v41 = vadd.f32 %v113_v37, %v110_v35  ;;  %v121_v42 = vmul.f32 %v120_v40, %v107_v34  ;;  %s125_s5 = scalar_lea.vmem %s552_s2, %s324_s21  ;;  %s330_s6 = sld [smem:[#allocation4 + $0x103]] }
  0x2a   :  { %s128_s9 = scalar_lea.vmem %s552_s2, %s325_s24  ;;  %s331_s10 = sld [smem:[#allocation4 + $0x183]]  ;;  %v126_v44 = vld [vmem:[%s125_s5] sm:$0x1] }
  0x2b   :  { %v118_v43 = vadd.f32 %v117_v39, %v114_v41  ;;  %s131_s13 = scalar_lea.vmem %s552_s2, %s326_s25  ;;  %s332_s14 = sld [smem:[#allocation2 + $0x4]]  ;;  %v129_v45 = vld [vmem:[%s128_s9] sm:$0x1] }
  0x2c   :  { %s134_s17 = scalar_lea.vmem %s552_s2, %s327_s26  ;;  %s333_s18 = sld [smem:[#allocation2 + $0x84]]  ;;  %v132_v47 = vld [vmem:[%s131_s13] sm:$0x1] }
  0x2d   :  { %v122_v46 = vadd.f32 %v121_v42, %v118_v43  ;;  %v137_v48 = vstv %s328_s28  ;;  %s334_s19 = sld [smem:[#allocation2 + $0x104]]  ;;  %v135_v49 = vld [vmem:[%s134_s17] sm:$0x1] }
  0x2e   :  { %v138_v50 = vmul.f32 %v137_v48, %v126_v44  ;;  %v140_v51 = vstv %s329_s29  ;;  %s335_s20 = sld [smem:[#allocation2 + $0x184]] }
  0x2f   :  { %123 = vst.msk [vmem:[%s553_s3 + $0x2] sm:$0x1] %vm66_vm0, %v122_v46  ;;  %v141_v52 = vmul.f32 %v140_v51, %v129_v45  ;;  %v144_v53 = vstv %s330_s6  ;;  %s336_s0 = sld [smem:[#allocation4 + $0x4]] }
  0x30   :  { %v145_v54 = vmul.f32 %v144_v53, %v132_v47  ;;  %v148_v55 = vstv %s331_s10  ;;  %s337_s23 = sld [smem:[#allocation4 + $0x84]] }
  0x31   :  { %v142_v56 = vadd.f32 %v141_v52, %v138_v50  ;;  %v149_v57 = vmul.f32 %v148_v55, %v135_v49  ;;  %s153_s26 = scalar_lea.vmem %s552_s2, %s332_s14  ;;  %s338_s1 = sld [smem:[#allocation4 + $0x104]] }
  0x32   :  { %s156_s29 = scalar_lea.vmem %s552_s2, %s333_s18  ;;  %s339_s30 = sld [smem:[#allocation4 + $0x184]]  ;;  %v154_v59 = vld [vmem:[%s153_s26] sm:$0x1] }
  0x33   :  { %v146_v58 = vadd.f32 %v145_v54, %v142_v56  ;;  %s159_s6 = scalar_lea.vmem %s552_s2, %s334_s19  ;;  %s340_s7 = sld [smem:[#allocation2 + $0x5]]  ;;  %v157_v60 = vld [vmem:[%s156_s29] sm:$0x1] }
  0x34   :  { %s162_s10 = scalar_lea.vmem %s552_s2, %s335_s20  ;;  %s341_s11 = sld [smem:[#allocation2 + $0x85]]  ;;  %v160_v62 = vld [vmem:[%s159_s6] sm:$0x1] }
  0x35   :  { %v150_v61 = vadd.f32 %v149_v57, %v146_v58  ;;  %v165_v63 = vstv %s336_s0  ;;  %s342_s12 = sld [smem:[#allocation2 + $0x105]]  ;;  %v163_v0 = vld [vmem:[%s162_s10] sm:$0x1] }
  0x36   :  { %v166_v1 = vmul.f32 %v165_v63, %v154_v59  ;;  %v168_v2 = vstv %s337_s23  ;;  %s343_s13 = sld [smem:[#allocation2 + $0x185]] }
  0x37   :  { %151 = vst.msk [vmem:[%s553_s3 + $0x3] sm:$0x1] %vm66_vm0, %v150_v61  ;;  %v169_v3 = vmul.f32 %v168_v2, %v157_v60  ;;  %v172_v4 = vstv %s338_s1  ;;  %s344_s16 = sld [smem:[#allocation4 + $0x5]] }
  0x38   :  { %v173_v5 = vmul.f32 %v172_v4, %v160_v62  ;;  %v176_v6 = vstv %s339_s30  ;;  %s345_s17 = sld [smem:[#allocation4 + $0x85]] }
  0x39   :  { %v170_v7 = vadd.f32 %v169_v3, %v166_v1  ;;  %v177_v8 = vmul.f32 %v176_v6, %v163_v0  ;;  %s181_s20 = scalar_lea.vmem %s552_s2, %s340_s7  ;;  %s346_s21 = sld [smem:[#allocation4 + $0x105]] }
  0x3a   :  { %s184_s23 = scalar_lea.vmem %s552_s2, %s341_s11  ;;  %s347_s24 = sld [smem:[#allocation4 + $0x185]]  ;;  %v182_v10 = vld [vmem:[%s181_s20] sm:$0x1] }
  0x3b   :  { %v174_v9 = vadd.f32 %v173_v5, %v170_v7  ;;  %s187_s1 = scalar_lea.vmem %s552_s2, %s342_s12  ;;  %s348_s27 = sld [smem:[#allocation2 + $0x6]]  ;;  %v185_v11 = vld [vmem:[%s184_s23] sm:$0x1] }
  0x3c   :  { %s190_s30 = scalar_lea.vmem %s552_s2, %s343_s13  ;;  %s349_s4 = sld [smem:[#allocation2 + $0x86]]  ;;  %v188_v13 = vld [vmem:[%s187_s1] sm:$0x1] }
  0x3d   :  { %v178_v12 = vadd.f32 %v177_v8, %v174_v9  ;;  %v193_v14 = vstv %s344_s16  ;;  %s350_s5 = sld [smem:[#allocation2 + $0x106]]  ;;  %v191_v15 = vld [vmem:[%s190_s30] sm:$0x1] }
  0x3e   :  { %v194_v16 = vmul.f32 %v193_v14, %v182_v10  ;;  %v196_v17 = vstv %s345_s17  ;;  %s351_s6 = sld [smem:[#allocation2 + $0x186]] }
  0x3f   :  { %179 = vst.msk [vmem:[%s553_s3 + $0x4] sm:$0x1] %vm66_vm0, %v178_v12  ;;  %v197_v18 = vmul.f32 %v196_v17, %v185_v11  ;;  %v200_v19 = vstv %s346_s21  ;;  %s352_s9 = sld [smem:[#allocation4 + $0x6]] }
  0x40   :  { %v201_v20 = vmul.f32 %v200_v19, %v188_v13  ;;  %v204_v21 = vstv %s347_s24  ;;  %s353_s10 = sld [smem:[#allocation4 + $0x86]] }
  0x41   :  { %v198_v22 = vadd.f32 %v197_v18, %v194_v16  ;;  %v205_v23 = vmul.f32 %v204_v21, %v191_v15  ;;  %s209_s13 = scalar_lea.vmem %s552_s2, %s348_s27  ;;  %s354_s14 = sld [smem:[#allocation4 + $0x106]] }
  0x42   :  { %s212_s17 = scalar_lea.vmem %s552_s2, %s349_s4  ;;  %s355_s18 = sld [smem:[#allocation4 + $0x186]]  ;;  %v210_v25 = vld [vmem:[%s209_s13] sm:$0x1] }
  0x43   :  { %v202_v24 = vadd.f32 %v201_v20, %v198_v22  ;;  %s215_s21 = scalar_lea.vmem %s552_s2, %s350_s5  ;;  %s356_s22 = sld [smem:[#allocation2 + $0x7]]  ;;  %v213_v26 = vld [vmem:[%s212_s17] sm:$0x1] }
  0x44   :  { %s218_s24 = scalar_lea.vmem %s552_s2, %s351_s6  ;;  %s357_s25 = sld [smem:[#allocation2 + $0x87]]  ;;  %v216_v28 = vld [vmem:[%s215_s21] sm:$0x1] }
  0x45   :  { %v206_v27 = vadd.f32 %v205_v23, %v202_v24  ;;  %v221_v29 = vstv %s352_s9  ;;  %s358_s26 = sld [smem:[#allocation2 + $0x107]]  ;;  %v219_v30 = vld [vmem:[%s218_s24] sm:$0x1] }
  0x46   :  { %v222_v31 = vmul.f32 %v221_v29, %v210_v25  ;;  %v224_v32 = vstv %s353_s10  ;;  %s359_s1 = sld [smem:[#allocation2 + $0x187]] }
  0x47   :  { %207 = vst.msk [vmem:[%s553_s3 + $0x5] sm:$0x1] %vm66_vm0, %v206_v27  ;;  %v225_v33 = vmul.f32 %v224_v32, %v213_v26  ;;  %v228_v34 = vstv %s354_s14  ;;  %s360_s29 = sld [smem:[#allocation4 + $0x7]] }
  0x48   :  { %v229_v35 = vmul.f32 %v228_v34, %v216_v28  ;;  %v232_v36 = vstv %s355_s18  ;;  %s361_s30 = sld [smem:[#allocation4 + $0x87]] }
  0x49   :  { %v226_v37 = vadd.f32 %v225_v33, %v222_v31  ;;  %v233_v38 = vmul.f32 %v232_v36, %v219_v30  ;;  %s237_s6 = scalar_lea.vmem %s552_s2, %s356_s22  ;;  %s362_s7 = sld [smem:[#allocation4 + $0x107]] }
  0x4a   :  { %s240_s10 = scalar_lea.vmem %s552_s2, %s357_s25  ;;  %s363_s11 = sld [smem:[#allocation4 + $0x187]]  ;;  %v238_v40 = vld [vmem:[%s237_s6] sm:$0x1] }
  0x4b   :  { %v230_v39 = vadd.f32 %v229_v35, %v226_v37  ;;  %s243_s14 = scalar_lea.vmem %s552_s2, %s358_s26  ;;  %v241_v41 = vld [vmem:[%s240_s10] sm:$0x1] }
  0x4c   :  { %s246_s17 = scalar_lea.vmem %s552_s2, %s359_s1  ;;  %v244_v43 = vld [vmem:[%s243_s14] sm:$0x1] }
  0x4d   :  { %v234_v42 = vadd.f32 %v233_v38, %v230_v39  ;;  %v249_v44 = vstv %s360_s29  ;;  %v247_v45 = vld [vmem:[%s246_s17] sm:$0x1] }
  0x4e   :  { %v250_v46 = vmul.f32 %v249_v44, %v238_v40  ;;  %v252_v47 = vstv %s361_s30 }
  0x4f   :  { %235 = vst.msk [vmem:[%s553_s3 + $0x6] sm:$0x1] %vm66_vm0, %v234_v42  ;;  %v253_v48 = vmul.f32 %v252_v47, %v241_v41  ;;  %v256_v49 = vstv %s362_s7 }
  0x50   :  { %v257_v50 = vmul.f32 %v256_v49, %v244_v43  ;;  %v260_v51 = vstv %s363_s11 }
  0x51   :  { %v254_v52 = vadd.f32 %v253_v48, %v250_v46  ;;  %v261_v53 = vmul.f32 %v260_v51, %v247_v45 }
  0x53   :  { %v258_v54 = vadd.f32 %v257_v50, %v254_v52 }
  0x55   :  { %v262_v55 = vadd.f32 %v261_v53, %v258_v54 }
  0x57   :  { %263 = vst.msk [vmem:[%s553_s3 + $0x7] sm:$0x1] %vm66_vm0, %v262_v55 }
  0x58   :  { %268 = vsyncpa [#allocation3], 1 }
  0x59   :  { %269 = vsyncpa [#allocation5], 1 }

</bundles_post_ra>
